<compile_context>
chip_gen: v6e
topology: v6e:2x2x1
jax: 0.10.0
libtpu: 0.0.40
codegen_flags: <defaults>
</compile_context>

<pallas_src>
import jax
import jax.numpy as jnp
from jax.experimental import pallas as pl
from jax.experimental.pallas import tpu as pltpu


def _attn_pool_kernel(q_ref, h_ref, m_ref, o_ref, m_sc, l_sc, acc_sc):
    # q_ref:   (k, dm)          shared pooling queries (native dtype)
    # h_ref:   (bb, tc, dm)     hidden-state chunk for bb batches (native dtype)
    # m_ref:   (bb, tc) int32   1 = keep, 0 = masked
    # o_ref:   (bb, k, dm)      pooled output (written on the last T step)
    # m_sc/l_sc: (bb, k, 1) f32 online-softmax running max / denominator
    # acc_sc:  (bb, k, dm) f32  unnormalized output accumulator
    bb, tc, dm = h_ref.shape
    k = q_ref.shape[0]
    t = pl.program_id(1)

    @pl.when(t == 0)
    def _():
        m_sc[...] = jnp.full_like(m_sc, -jnp.inf)
        l_sc[...] = jnp.zeros_like(l_sc)
        acc_sc[...] = jnp.zeros_like(acc_sc)

    q = q_ref[...]                                   # native dtype, no f32 shadow
    h = h_ref[...]
    qb = jnp.broadcast_to(q[None], (bb, k, dm))      # hoisted, tiny

    # logits[b, i, t] = sum_d q[i, d] * h[b, t, d] -> (bb, k, tc), f32 acc on MXU
    logits = jnp.einsum("bkd,btd->bkt", qb, h,
                        preferred_element_type=jnp.float32)

    # masked_fill(~mask, -10000.0): finite fill == exact PyTorch semantics
    keep = m_ref[...] != 0                           # (bb, tc)
    logits = jnp.where(keep[:, None, :], logits, jnp.float32(-10000.0))

    # Online softmax across T chunks (exact: fill values are finite, never -inf,
    # so the running max is finite after the first chunk and alpha never NaNs).
    m_new = jnp.maximum(m_sc[...], jnp.max(logits, axis=-1, keepdims=True))
    alpha = jnp.exp(m_sc[...] - m_new)               # (bb, k, 1)
    p = jnp.exp(logits - m_new)                      # (bb, k, tc) f32, unnormalized
    l_sc[...] = alpha * l_sc[...] + jnp.sum(p, axis=-1, keepdims=True)
    # Second matmul on the *unnormalized* probabilities, in the input dtype.
    acc_sc[...] = alpha * acc_sc[...] + jnp.einsum(
        "bkt,btd->bkd", p.astype(h.dtype), h,
        preferred_element_type=jnp.float32)
    m_sc[...] = m_new

    @pl.when(t == pl.num_programs(1) - 1)
    def _():
        # Normalize after the matmul: an exact reciprocal over only bb*k values
        # (instead of an approx reciprocal over bb*k*T) -> exact softmax.
        inv = 1.0 / l_sc[...]                        # (bb, k, 1), exact
        o_ref[...] = (acc_sc[...] * inv).astype(o_ref.dtype)


def _vmem_caps():
    """(vmem_limit_bytes, block_budget_bytes), derived from one HW number."""
    try:
        cap = getattr(pltpu.get_tpu_info(), "vmem_capacity_bytes",
                      64 * 1024 * 1024)
    except Exception:
        cap = 64 * 1024 * 1024                       # conservative (v7x) fallback
    vmem_limit = int(cap * 0.75)                     # ~96 MiB v5e/v6e, ~48 MiB v7x
    block_budget = int(cap * 0.55)                   # what the pipelined blocks use
    return vmem_limit, block_budget


def _pick_blocks(B, T, dm, k, itemsize, block_budget):
    """Pick (batches-per-step bb, T-chunk tc).

    Accounts for ALL per-step VMEM users (double-buffered hidden/mask/output
    blocks, online-softmax scratch, f32 intermediates).  bb is either == B or a
    multiple of 8 and tc is either == T or a 128-multiple dividing T (so the
    (8,128) BlockSpec rule holds and the T reduction never reads ragged data).
    For B >= 16 we keep >= 2 batch steps so 'parallel' can use both v7x cores.
    """
    def per_batch(tc):
        hidden = 2 * tc * dm * itemsize              # double-buffered input block
        mask = 2 * tc * 4                            # double-buffered int32 mask
        outb = 2 * k * dm * itemsize                 # double-buffered output block
        scratch = k * dm * 4 + 2 * k * 4             # acc + (m, l) accumulators
        interm = 3 * k * tc * 4 + 3 * k * dm * 4     # logits/p/p-cast, qb/acc upd
        return hidden + mask + outb + scratch + interm

    budget = block_budget - 2 * k * dm * itemsize    # shared query block
    min_bb = B if B <= 8 else 8

    tc = T
    if min_bb * per_batch(T) > budget:
        for c in (2048, 1024, 512, 256, 128):
            if T % c == 0 and min_bb * per_batch(c) <= budget:
                tc = c
                break
        # TODO(synk): if T has no fitting 128-multiple divisor we fall back to
        # tc == T and rely on vmem_limit_bytes headroom (may spill).

    bb = max(min_bb, budget // per_batch(tc))
    bb = min(bb, B)
    if bb != B:
        bb = max(8, (bb // 8) * 8)                   # mask-block sublane rule
    if B >= 16:
        bb = min(bb, max(8, (pl.cdiv(B, 2) // 8) * 8))  # >= 2 steps for 2 TCs
    return bb, tc


def attention_pooling(query, hidden, mask):
    """query: (k, dm), hidden: (B, T, dm), mask: (B, T) bool -> (B, k, dm).

    Bandwidth-bound: feed hidden/query in bf16 upstream when tolerable.
    """
    k, dm = query.shape
    B, T, dm2 = hidden.shape
    assert dm == dm2
    query = query.astype(hidden.dtype)
    mask_i = mask.astype(jnp.int32)
    # TODO(synk): if masks are guaranteed prefix-only, scalar-prefetch per-batch
    # lengths and build `keep` from an iota instead of shipping the mask.

    itemsize = jnp.dtype(hidden.dtype).itemsize
    vmem_limit, block_budget = _vmem_caps()
    bb, tc = _pick_blocks(B, T, dm, k, itemsize, block_budget)
    nb = pl.cdiv(B, bb)          # ragged last batch block: rows beyond B are
    nt = T // tc                 #   computed on padding and dropped on write
    cost = pl.CostEstimate(
        flops=4 * B * k * T * dm,                    # two matmuls
        transcendentals=B * k * T,                   # exp
        bytes_accessed=(B * T * dm * itemsize        # hidden
                        + k * dm * itemsize          # query
                        + B * T * 4                  # int32 mask
                        + B * k * dm * itemsize),    # output
    )

    return pl.pallas_call(
        _attn_pool_kernel,
        out_shape=jax.ShapeDtypeStruct((B, k, dm), hidden.dtype),
        grid_spec=pltpu.PrefetchScalarGridSpec(
            num_scalar_prefetch=0,
            grid=(nb, nt),
            in_specs=[
                pl.BlockSpec((k, dm), lambda b, t: (0, 0)),          # query
                pl.BlockSpec((bb, tc, dm), lambda b, t: (b, t, 0)),  # hidden chunk
                pl.BlockSpec((bb, tc), lambda b, t: (b, t)),         # int32 mask
            ],
            out_specs=pl.BlockSpec((bb, k, dm), lambda b, t: (b, 0, 0)),
            scratch_shapes=[
                pltpu.VMEM((bb, k, 1), jnp.float32),   # running max
                pltpu.VMEM((bb, k, 1), jnp.float32),   # running denominator
                pltpu.VMEM((bb, k, dm), jnp.float32),  # unnormalized output acc
            ],
        ),
        compiler_params=pltpu.CompilerParams(
            dimension_semantics=("parallel", "arbitrary"),
            vmem_limit_bytes=vmem_limit,
        ),
        cost_estimate=cost,
    )(query, hidden, mask_i)


def _reference(query, hidden, mask):
    # Pure-JAX reference mirroring the PyTorch forward exactly (all f32).
    logits = jnp.einsum("kd,btd->bkt", query, hidden)
    logits = jnp.where(mask[:, None, :], logits, -10000.0)
    attn = jax.nn.softmax(logits, axis=-1)
    return jnp.einsum("bkt,btd->bkd", attn, hidden)


if __name__ == "__main__":
    # Small, deterministic shapes: batch=4, seq T=16, dm=32, k pooled queries=8.
    B, T, DM, K = 4, 16, 32, 8
    key = jax.random.PRNGKey(0)
    kq, kh = jax.random.split(key, 2)

    query = jax.random.normal(kq, (K, DM), dtype=jnp.float32)
    hidden = jax.random.normal(kh, (B, T, DM), dtype=jnp.float32)
    lengths = jnp.array([T, T - 5, T - 9, 3], dtype=jnp.int32)
    mask = jnp.arange(T)[None, :] < lengths[:, None]          # (B, T) bool

    # f32 path.  Softmax numerics are now exact (post-matmul normalization);
    # remaining tolerance covers the MXU's default-precision f32 matmuls
    # (bf16 passes) in both kernel and reference.
    out = jax.block_until_ready(attention_pooling(query, hidden, mask))
    ref = _reference(query, hidden, mask)
    assert out.shape == (B, K, DM)
    assert jnp.allclose(out, ref, atol=5e-3, rtol=5e-3), "f32 mismatch vs reference"

    # bf16 path: matmuls run natively in bf16 on the MXU (f32 accumulate/softmax).
    q16 = query.astype(jnp.bfloat16)
    h16 = hidden.astype(jnp.bfloat16)
    out16 = jax.block_until_ready(attention_pooling(q16, h16, mask))
    ref16 = _reference(q16.astype(jnp.float32), h16.astype(jnp.float32), mask)
    assert out16.shape == (B, K, DM)
    assert out16.dtype == jnp.bfloat16
    assert jnp.allclose(out16.astype(jnp.float32), ref16, atol=5e-2, rtol=5e-2), \
        "bf16 mismatch vs reference"

    print("KERNEL_OK")
</pallas_src>

<mosaic_0001>
module attributes {stable_mosaic.version = 11 : i64} {
  func.func @_attn_pool_kernel(%arg0: i32, %arg1: i32, %arg2: memref<8x32xf32, #tpu.memory_space<vmem>>, %arg3: memref<4x16x32xf32, #tpu.memory_space<vmem>>, %arg4: memref<4x16xi32, #tpu.memory_space<vmem>>, %arg5: memref<4x8x32xf32, #tpu.memory_space<vmem>>, %arg6: memref<4x8x1xf32, #tpu.memory_space<vmem>>, %arg7: memref<4x8x1xf32, #tpu.memory_space<vmem>>, %arg8: memref<4x8x32xf32, #tpu.memory_space<vmem>>) attributes {dimension_semantics = [#tpu.dimension_semantics<parallel>, #tpu.dimension_semantics<arbitrary>], iteration_bounds = array<i64: 1, 1>, scalar_prefetch = 0 : i64, scratch_operands = 3 : i64, tpu.core_type = #tpu.core_type<tc>, window_params = [{pipeline_mode = #tpu.pipeline_mode<synchronous>, transform_indices = @transform_0, window_bounds = array<i64: 8, 32>}, {transform_indices = @transform_1, window_bounds = array<i64: 4, 16, 32>}, {transform_indices = @transform_2, window_bounds = array<i64: 4, 16>}, {transform_indices = @transform_3, window_bounds = array<i64: 4, 8, 32>}]} {
    %c0_i32 = arith.constant 0 : i32
    %0 = arith.cmpi eq, %arg1, %c0_i32 : i32
    %1 = arith.extui %0 : i1 to i32
    %c0_i32_0 = arith.constant 0 : i32
    %2 = arith.cmpi ne, %1, %c0_i32_0 : i32
    scf.if %2 {
      %cst_35 = arith.constant 0xFF800000 : f32
      %43 = vector.broadcast %cst_35 : f32 to vector<4x8x1xf32>
      %c0_36 = arith.constant 0 : index
      %c0_37 = arith.constant 0 : index
      %c0_38 = arith.constant 0 : index
      %44 = vector.load %arg6[%c0_36, %c0_37, %c0_38] : memref<4x8x1xf32, #tpu.memory_space<vmem>>, vector<4x8x1xf32>
      tpu.vector_store %arg6[%c0_36, %c0_37, %c0_38], %43 {strides = array<i32>} : memref<4x8x1xf32, #tpu.memory_space<vmem>>, vector<4x8x1xf32>,
      %cst_39 = arith.constant 0.000000e+00 : f32
      %45 = vector.broadcast %cst_39 : f32 to vector<4x8x1xf32>
      %c0_40 = arith.constant 0 : index
      %c0_41 = arith.constant 0 : index
      %c0_42 = arith.constant 0 : index
      %46 = vector.load %arg7[%c0_40, %c0_41, %c0_42] : memref<4x8x1xf32, #tpu.memory_space<vmem>>, vector<4x8x1xf32>
      tpu.vector_store %arg7[%c0_40, %c0_41, %c0_42], %45 {strides = array<i32>} : memref<4x8x1xf32, #tpu.memory_space<vmem>>, vector<4x8x1xf32>,
      %cst_43 = arith.constant 0.000000e+00 : f32
      %47 = vector.broadcast %cst_43 : f32 to vector<4x8x32xf32>
      %c0_44 = arith.constant 0 : index
      %c0_45 = arith.constant 0 : index
      %c0_46 = arith.constant 0 : index
      %48 = vector.load %arg8[%c0_44, %c0_45, %c0_46] : memref<4x8x32xf32, #tpu.memory_space<vmem>>, vector<4x8x32xf32>
      tpu.vector_store %arg8[%c0_44, %c0_45, %c0_46], %47 {strides = array<i32>} : memref<4x8x32xf32, #tpu.memory_space<vmem>>, vector<4x8x32xf32>,
    } else {
    }
    %c0 = arith.constant 0 : index
    %c0_1 = arith.constant 0 : index
    %3 = vector.load %arg2[%c0, %c0_1] : memref<8x32xf32, #tpu.memory_space<vmem>>, vector<8x32xf32>
    %c0_2 = arith.constant 0 : index
    %c0_3 = arith.constant 0 : index
    %c0_4 = arith.constant 0 : index
    %4 = vector.load %arg3[%c0_2, %c0_3, %c0_4] : memref<4x16x32xf32, #tpu.memory_space<vmem>>, vector<4x16x32xf32>
    %5 = vector.shape_cast %3 : vector<8x32xf32> to vector<1x8x32xf32>
    %6 = vector.shape_cast %5 : vector<1x8x32xf32> to vector<1x8x32xf32>
    %7 = vector.broadcast %6 : vector<1x8x32xf32> to vector<4x8x32xf32>
    "tpu.trace_start"() <{level = 10 : i32, message = "bkd,btd->bkt"}> : () -> ()
    %cst = arith.constant dense<0.000000e+00> : vector<4x8x16xf32>
    %8 = tpu.matmul %7, %4, %cst {dimension_numbers = #tpu.dot_dimension_numbers<[2], [2], [1], [1], [0, 0, 0, 1, 1, 1], [0], [0]>} : vector<4x8x32xf32>, vector<4x16x32xf32>, vector<4x8x16xf32> -> vector<4x8x16xf32>
    "tpu.trace_stop"() : () -> ()
    %c0_5 = arith.constant 0 : index
    %c0_6 = arith.constant 0 : index
    %9 = vector.load %arg4[%c0_5, %c0_6] : memref<4x16xi32, #tpu.memory_space<vmem>>, vector<4x16xi32>
    %c0_i32_7 = arith.constant 0 : i32
    %10 = vector.broadcast %c0_i32_7 : i32 to vector<4x16xi32>
    %11 = arith.cmpi ne, %9, %10 : vector<4x16xi32>
    %12 = vector.shape_cast %11 : vector<4x16xi1> to vector<4x1x16xi1>
    %cst_8 = arith.constant -1.000000e+04 : f32
    %13 = vector.shape_cast %12 : vector<4x1x16xi1> to vector<4x1x16xi1>
    %14 = vector.broadcast %13 : vector<4x1x16xi1> to vector<4x8x16xi1>
    %15 = vector.broadcast %cst_8 : f32 to vector<4x8x16xf32>
    %16 = arith.select %14, %8, %15 : vector<4x8x16xi1>, vector<4x8x16xf32>
    %c0_9 = arith.constant 0 : index
    %c0_10 = arith.constant 0 : index
    %c0_11 = arith.constant 0 : index
    %17 = vector.load %arg6[%c0_9, %c0_10, %c0_11] : memref<4x8x1xf32, #tpu.memory_space<vmem>>, vector<4x8x1xf32>
    %cst_12 = arith.constant dense<0xFF800000> : vector<4x8xf32>
    %18 = vector.multi_reduction <maximumf>, %16, %cst_12 [2] : vector<4x8x16xf32> to vector<4x8xf32>
    %19 = vector.shape_cast %18 : vector<4x8xf32> to vector<4x8x1xf32>
    %20 = arith.maximumf %17, %19 : vector<4x8x1xf32>
    %c0_13 = arith.constant 0 : index
    %c0_14 = arith.constant 0 : index
    %c0_15 = arith.constant 0 : index
    %21 = vector.load %arg6[%c0_13, %c0_14, %c0_15] : memref<4x8x1xf32, #tpu.memory_space<vmem>>, vector<4x8x1xf32>
    %22 = arith.subf %21, %20 : vector<4x8x1xf32>
    %23 = math.exp %22 : vector<4x8x1xf32>
    %24 = vector.broadcast %20 : vector<4x8x1xf32> to vector<4x8x16xf32>
    %25 = arith.subf %16, %24 : vector<4x8x16xf32>
    %26 = math.exp %25 : vector<4x8x16xf32>
    %c0_16 = arith.constant 0 : index
    %c0_17 = arith.constant 0 : index
    %c0_18 = arith.constant 0 : index
    %27 = vector.load %arg7[%c0_16, %c0_17, %c0_18] : memref<4x8x1xf32, #tpu.memory_space<vmem>>, vector<4x8x1xf32>
    %28 = arith.mulf %23, %27 : vector<4x8x1xf32>
    %cst_19 = arith.constant dense<0.000000e+00> : vector<4x8xf32>
    %29 = vector.multi_reduction <add>, %26, %cst_19 [2] : vector<4x8x16xf32> to vector<4x8xf32>
    %30 = vector.shape_cast %29 : vector<4x8xf32> to vector<4x8x1xf32>
    %31 = arith.addf %28, %30 : vector<4x8x1xf32>
    %c0_20 = arith.constant 0 : index
    %c0_21 = arith.constant 0 : index
    %c0_22 = arith.constant 0 : index
    %32 = vector.load %arg7[%c0_20, %c0_21, %c0_22] : memref<4x8x1xf32, #tpu.memory_space<vmem>>, vector<4x8x1xf32>
    tpu.vector_store %arg7[%c0_20, %c0_21, %c0_22], %31 {strides = array<i32>} : memref<4x8x1xf32, #tpu.memory_space<vmem>>, vector<4x8x1xf32>,
    %c0_23 = arith.constant 0 : index
    %c0_24 = arith.constant 0 : index
    %c0_25 = arith.constant 0 : index
    %33 = vector.load %arg8[%c0_23, %c0_24, %c0_25] : memref<4x8x32xf32, #tpu.memory_space<vmem>>, vector<4x8x32xf32>
    %34 = vector.broadcast %23 : vector<4x8x1xf32> to vector<4x8x32xf32>
    %35 = arith.mulf %34, %33 : vector<4x8x32xf32>
    "tpu.trace_start"() <{level = 10 : i32, message = "bkt,btd->bkd"}> : () -> ()
    %cst_26 = arith.constant dense<0.000000e+00> : vector<4x8x32xf32>
    %36 = tpu.matmul %26, %4, %cst_26 {dimension_numbers = #tpu.dot_dimension_numbers<[2], [1], [1], [2], [0, 0, 0, 1, 1, 2], [0], [0]>} : vector<4x8x16xf32>, vector<4x16x32xf32>, vector<4x8x32xf32> -> vector<4x8x32xf32>
    "tpu.trace_stop"() : () -> ()
    %37 = arith.addf %35, %36 : vector<4x8x32xf32>
    %c0_27 = arith.constant 0 : index
    %c0_28 = arith.constant 0 : index
    %c0_29 = arith.constant 0 : index
    %38 = vector.load %arg8[%c0_27, %c0_28, %c0_29] : memref<4x8x32xf32, #tpu.memory_space<vmem>>, vector<4x8x32xf32>
    tpu.vector_store %arg8[%c0_27, %c0_28, %c0_29], %37 {strides = array<i32>} : memref<4x8x32xf32, #tpu.memory_space<vmem>>, vector<4x8x32xf32>,
    %c0_30 = arith.constant 0 : index
    %c0_31 = arith.constant 0 : index
    %c0_32 = arith.constant 0 : index
    %39 = vector.load %arg6[%c0_30, %c0_31, %c0_32] : memref<4x8x1xf32, #tpu.memory_space<vmem>>, vector<4x8x1xf32>
    tpu.vector_store %arg6[%c0_30, %c0_31, %c0_32], %20 {strides = array<i32>} : memref<4x8x1xf32, #tpu.memory_space<vmem>>, vector<4x8x1xf32>,
    %c0_i32_33 = arith.constant 0 : i32
    %40 = arith.cmpi eq, %arg1, %c0_i32_33 : i32
    %41 = arith.extui %40 : i1 to i32
    %c0_i32_34 = arith.constant 0 : i32
    %42 = arith.cmpi ne, %41, %c0_i32_34 : i32
    scf.if %42 {
      %c0_35 = arith.constant 0 : index
      %c0_36 = arith.constant 0 : index
      %c0_37 = arith.constant 0 : index
      %43 = vector.load %arg7[%c0_35, %c0_36, %c0_37] : memref<4x8x1xf32, #tpu.memory_space<vmem>>, vector<4x8x1xf32>
      %cst_38 = arith.constant 1.000000e+00 : f32
      %44 = vector.broadcast %cst_38 : f32 to vector<4x8x1xf32>
      %45 = arith.divf %44, %43 : vector<4x8x1xf32>
      %c0_39 = arith.constant 0 : index
      %c0_40 = arith.constant 0 : index
      %c0_41 = arith.constant 0 : index
      %46 = vector.load %arg8[%c0_39, %c0_40, %c0_41] : memref<4x8x32xf32, #tpu.memory_space<vmem>>, vector<4x8x32xf32>
      %47 = vector.broadcast %45 : vector<4x8x1xf32> to vector<4x8x32xf32>
      %48 = arith.mulf %46, %47 : vector<4x8x32xf32>
      %c0_42 = arith.constant 0 : index
      %c0_43 = arith.constant 0 : index
      %c0_44 = arith.constant 0 : index
      %49 = vector.load %arg5[%c0_42, %c0_43, %c0_44] : memref<4x8x32xf32, #tpu.memory_space<vmem>>, vector<4x8x32xf32>
      tpu.vector_store %arg5[%c0_42, %c0_43, %c0_44], %48 {strides = array<i32>} : memref<4x8x32xf32, #tpu.memory_space<vmem>>, vector<4x8x32xf32>,
    } else {
    }
    return
  }
  func.func @transform_0(%arg0: i32, %arg1: i32) -> (i32, i32) {
    %c0_i32 = arith.constant 0 : i32
    %c0_i32_0 = arith.constant 0 : i32
    %c0_i32_1 = arith.constant 0 : i32
    return %c0_i32, %c0_i32_0 : i32, i32
  }
  func.func @transform_1(%arg0: i32, %arg1: i32) -> (i32, i32, i32) {
    %c0_i32 = arith.constant 0 : i32
    %c0_i32_0 = arith.constant 0 : i32
    return %arg0, %arg1, %c0_i32 : i32, i32, i32
  }
  func.func @transform_2(%arg0: i32, %arg1: i32) -> (i32, i32) {
    %c0_i32 = arith.constant 0 : i32
    return %arg0, %arg1 : i32, i32
  }
  func.func @transform_3(%arg0: i32, %arg1: i32) -> (i32, i32, i32) {
    %c0_i32 = arith.constant 0 : i32
    %c0_i32_0 = arith.constant 0 : i32
    %c0_i32_1 = arith.constant 0 : i32
    return %arg0, %c0_i32, %c0_i32_0 : i32, i32, i32
  }
}

</mosaic_0001>

<bundles_post_ra>
// kernel: tpu_custom_call.1
= control target key start
LH: loop header
LB: loop body
LE: loop exit
PB: predicated region body
PF: predicated region fallthrough
CT: control target
= control target key end

     0   :  { %8 = vsyncpa [#allocation6], 0  ;;  %s1313_s0 = inlined_call_operand.hbm [shape: f32[8,32], index: 0, kind: input, shape index: {}]   ;;  %s1314_s1 = inlined_call_operand.hbm [shape: f32[4,16,32], index: 1, kind: input, shape index: {}]   ;;  %s1315_s2 = inlined_call_operand.hbm [shape: s32[4,16], index: 2, kind: input, shape index: {}]   ;;  %s1316_s3 = inlined_call_operand.hbm [shape: f32[4,8,32], index: 3, kind: output, shape index: {}]  }
   0x1   :  { %9 = vsyncpa [#allocation9], 0 }
   0x2   :  { %10 = vsyncpa [#allocation7], 0  ;;  %s1156_s12 = smov [#allocation8]  }
   0x3   :  { %s26_s13 = sshll.u32 %s1156_s12, 4  ;;  %s27_s13 = int_to_ptr.vmem [resolvable:$true] %s26_s13 }
   0x4   :  { %s1078_s14 = scalar_lea.vmem %s27_s13, 1024  ;;  %p1083_p1 = scmp.lt.s32.totalorder %s27_s13, %s27_s13 }
   0x5   :  { %p1079_p0 = scmp.ne.s32.totalorder %s27_s13, %s1078_s14  ;;  %p1084_p2 = scmp.lt.s32.totalorder %s1078_s14, %s1078_s14 }
   0x7   :  { %p1085_p3 = por %p1084_p2, %p1083_p1 }
   0x9   :  { %p1086_p4 = pnand %p1085_p3, %p1079_p0 }
   0xb   :  { %1089 = shalt.err (!%p1086_p4)
}
   0xc   :  { %s1157_s15 = smov 128   ;;  %s1158_s16 = smov 8  }
   0xd   :  { %32 = dma.hbm_to_vmem [thread:$0]  %s1314_s1, 1024, %s27_s13, [#allocation9], %s1157_s15, %s1157_s15, %s1158_s16  }
   0xe   :  { %s1159_s19 = smov [#allocation5]   ;;  %s1160_s21 = smov [#allocation10]  }
   0xf   :  { %s17_s20 = sshll.u32 %s1159_s19, 4  ;;  %s39_s22 = sshll.u32 %s1160_s21, 4  ;;  %s18_s20 = int_to_ptr.vmem [resolvable:$true] %s17_s20  ;;  %s40_s22 = int_to_ptr.vmem [resolvable:$true] %s39_s22 }
  0x10   :  { %s1098_s23 = scalar_lea.vmem %s18_s20, 128  ;;  %p1103_p6 = scmp.lt.s32.totalorder %s18_s20, %s18_s20 }
  0x11   :  { %p1099_p5 = scmp.ne.s32.totalorder %s18_s20, %s1098_s23  ;;  %p1104_p7 = scmp.lt.s32.totalorder %s1098_s23, %s1098_s23 }
  0x13   :  { %p1105_p8 = por %p1104_p7, %p1103_p6 }
  0x15   :  { %p1106_p9 = pnand %p1105_p8, %p1099_p5 }
  0x17   :  { %1109 = shalt.err (!%p1106_p9)
}
  0x18   :  { %20 = dma.hbm_to_vmem [thread:$0]  %s1313_s0, 128, %s18_s20, [#allocation6]  }
  0x19   :  { %s1118_s26 = scalar_lea.vmem %s40_s22, 64  ;;  %p1123_p11 = scmp.lt.s32.totalorder %s40_s22, %s40_s22 }
  0x1a   :  { %p1119_p10 = scmp.ne.s32.totalorder %s40_s22, %s1118_s26  ;;  %p1124_p12 = scmp.lt.s32.totalorder %s1118_s26, %s1118_s26 }
  0x1c   :  { %p1125_p13 = por %p1124_p12, %p1123_p11 }
  0x1e   :  { %p1126_p0 = pnand %p1125_p13, %p1119_p10 }
  0x20   :  { %1129 = shalt.err (!%p1126_p0)
}
  0x21   :  { %42 = dma.hbm_to_vmem [thread:$0]  %s1315_s2, 64, %s40_s22, [#allocation9]  }
  0x22   :  { %1150 = dma.done.wait [#allocation6], 128  }
  0x23   :  { %1151 = vsyncadd [#allocation6], 4294967168 }
  0x24   :  { %1152 = dma.done.wait [#allocation9], 1088  }
  0x25   :  { %1153 = vsyncadd [#allocation9], 4294966208  ;;  %vm65_vm0 = vcmask 261120   ;;  %v1161_v0 = vmov 0.0   ;;  %vm1162_vm1 = vmmov 0   ;;  %v72_v1 = vld [vmem:[#allocation8 + $0x8] sm:$0xff]  ;;  %v393_v14 = vlaneseq }
  0x26   :  { %977 = vmatprep.subr.mxu0 %v1161_v0  ;;  %66 = vst.msk [vmem:[#allocation4] sm:$0xff] %vm65_vm0, %v1161_v0  ;;  %67 = vst.msk [vmem:[#allocation4 + $0x8] sm:$0xff] %vm65_vm0, %v1161_v0  ;;  %984 = vmatprep.subr.mxu1 %v1161_v0  ;;  %v74_v2 = vld [vmem:[#allocation8 + $0x18] sm:$0xff]  ;;  %v71_v3 = vld [vmem:[#allocation8] sm:$0xff]  ;;  %v1163_v10 = vmov 0   ;;  %vm56_vm2 = vcmask 7168  }
  0x27   :  { %68 = vst.msk [vmem:[#allocation4 + $0x10] sm:$0xff] %vm65_vm0, %v1161_v0  ;;  %69 = vst.msk [vmem:[#allocation4 + $0x18] sm:$0xff] %vm65_vm0, %v1161_v0  ;;  %981 = vmatprep.mubr.msk.f32.mxu0 %vm1162_vm1, %v1161_v0  ;;  %988 = vmatprep.mubr.msk.f32.mxu1 %vm1162_vm1, %v1161_v0  ;;  %v73_v4 = vld [vmem:[#allocation8 + $0x10] sm:$0xff]  ;;  %v70_v5 = vld [vmem:[#allocation5] sm:$0xff]  ;;  %v1164_v11 = vmov -inf   ;;  %v394_v17 = vshrl.u32 %v393_v14, 7 }
  0x28   :  { %978 = vmatpush3.xpose.msk.msra.mxu0 %vm65_vm0, %v72_v1  ;;  %985 = vmatpush3.xpose.msk.msra.mxu1 %vm65_vm0, %v74_v2  ;;  %v1220_v6 = vld [vmem:[#allocation8 + $0x28] sm:$0xff]  ;;  %v1223_v7 = vld [vmem:[#allocation8 + $0x38] sm:$0xff]  ;;  %v1232_v8 = vld [vmem:[#allocation8 + $0x20] sm:$0xff]  ;;  %57 = vst.msk [vmem:[#allocation2] sm:$0xff] %vm56_vm2, %v1164_v11  ;;  %v1165_v12 = vmov 1966171168  }
  0x29   :  { %979 = vmatprep.subr.mxu0 %v1161_v0  ;;  %986 = vmatprep.subr.mxu1 %v1161_v0  ;;  %v1235_v9 = vld [vmem:[#allocation8 + $0x30] sm:$0xff]  ;;  %58 = vst.msk [vmem:[#allocation2 + $0x8] sm:$0xff] %vm56_vm2, %v1164_v11  ;;  %59 = vst.msk [vmem:[#allocation2 + $0x10] sm:$0xff] %vm56_vm2, %v1164_v11  ;;  %v391_v13 = vunpack.c.l.s4 %v1165_v12  ;;  %v387_v15 = vld [vmem:[#allocation10] sm:$0xf]  ;;  %v424_v24 = vsub.s32 0, %v394_v17 }
  0x2a   :  { %1044 = vset.pattern.permute.xlu0 %v1163_v10  ;;  %1045 = vset.pattern.permute.xlu1 %v1163_v10  ;;  %60 = vst.msk [vmem:[#allocation2 + $0x18] sm:$0xff] %vm56_vm2, %v1164_v11  ;;  %61 = vst.msk [vmem:[#allocation3] sm:$0xff] %vm56_vm2, %v1161_v0  ;;  %vm388_vm3 = vcmp.ne.s32.totalorder %v387_v15, 0  ;;  %vm450_vm10 = vcmask 130048   ;;  %s1166_s0 = smov [#allocation11]  }
  0x2b   :  { %62 = vst.msk [vmem:[#allocation3 + $0x8] sm:$0xff] %vm56_vm2, %v1161_v0  ;;  %63 = vst.msk [vmem:[#allocation3 + $0x10] sm:$0xff] %vm56_vm2, %v1161_v0  ;;  %v392_v16 = vunpack.c.0.s8 %v391_v13  ;;  %v389_v19 = vsel %vm388_vm3, 1, %v1163_v10  ;;  %s924_s2 = sshll.u32 %s1166_s0, 4  ;;  %s925_s2 = int_to_ptr.vmem [resolvable:$true] %s924_s2 }
  0x2c   :  { %980 = vmatpush3.xpose.msk.msra.mxu0 %vm65_vm0, %v71_v3  ;;  %987 = vmatpush3.xpose.msk.msra.mxu1 %vm65_vm0, %v73_v4  ;;  %64 = vst.msk [vmem:[#allocation3 + $0x18] sm:$0xff] %vm56_vm2, %v1161_v0  ;;  %s1130_s28 = scalar_lea.vmem %s925_s2, 512  ;;  %p1135_p2 = scmp.lt.s32.totalorder %s925_s2, %s925_s2 }
  0x2d   :  { %991 = vmatprep.subr.mxu0 %v1161_v0  ;;  %998 = vmatprep.subr.mxu1 %v1161_v0  ;;  %v395_v18 = vsub.s32 %v392_v16, %v394_v17  ;;  %p1131_p1 = scmp.ne.s32.totalorder %s925_s2, %s1130_s28  ;;  %p1136_p3 = scmp.lt.s32.totalorder %s1130_s28, %s1130_s28 }
  0x2f   :  { %982 = vmatmul.mubr.msk.f32.vlgmr.msra.gmra.mxu0 %vm65_vm0, %v70_v5  ;;  %989 = vmatmul.mubr.msk.f32.vlgmr.msra.gmra.mxu1 %vm65_vm0, %v70_v5  ;;  %v396_v20 = vrot.slane %v389_v19, %v395_v18  ;;  %v446_v51 = vld [vmem:[#allocation2] sm:$0xff]  ;;  %p1137_p4 = por %p1136_p3, %p1135_p2 }
  0x30   :  { %992 = vmatpush3.xpose.msk.msra.mxu0 %vm65_vm0, %v1220_v6  ;;  %999 = vmatpush3.xpose.msk.msra.mxu1 %vm65_vm0, %v1223_v7  ;;  %v447_v54 = vld [vmem:[#allocation2 + $0x8] sm:$0xff]  ;;  %v448_v58 = vld [vmem:[#allocation2 + $0x10] sm:$0xff] }
  0x31   :  { %993 = vmatprep.subr.mxu0 %v1161_v0  ;;  %1000 = vmatprep.subr.mxu1 %v1161_v0  ;;  %v397_v21 = vcombine.high %v396_v20, %v396_v20  ;;  %v404_v22 = vrot.slane %v396_v20, %v395_v18  ;;  %v449_v62 = vld [vmem:[#allocation2 + $0x18] sm:$0xff]  ;;  %p1138_p5 = pnand %p1137_p4, %p1131_p1 }
  0x32   :  { %995 = vmatprep.mubr.msk.f32.mxu0 %vm1162_vm1, %v1161_v0  ;;  %1002 = vmatprep.mubr.msk.f32.mxu1 %vm1162_vm1, %v1161_v0 }
  0x33   :  { %v411_v23 = vrot.slane %v397_v21, %v395_v18  ;;  %vm414_vm4 = vcmp.ne.s32.totalorder %v404_v22, 0  ;;  %v412_v27 = vcombine.high %v404_v22, %v404_v22 }
  0x34   :  { %994 = vmatpush3.xpose.msk.msra.mxu0 %vm65_vm0, %v1232_v8  ;;  %1001 = vmatpush3.xpose.msk.msra.mxu1 %vm65_vm0, %v1235_v9  ;;  %v418_v25 = vsel %vm414_vm4, 1, %v1163_v10 }
  0x35   :  { %1005 = vmatprep.subr.mxu0 %v1161_v0  ;;  %1012 = vmatprep.subr.mxu1 %v1161_v0  ;;  %vm415_vm5 = vcmp.ne.s32.totalorder %v411_v23, 0  ;;  %v413_v28 = vcombine.high %v411_v23, %v411_v23  ;;  %v425_v29 = vrot.slane %v418_v25, %v424_v24  ;;  %vm416_vm6 = vcmp.ne.s32.totalorder %v412_v27, 0 }
  0x36   :  { %v419_v26 = vsel %vm415_vm5, 1, %v1163_v10  ;;  %v420_v31 = vsel %vm416_vm6, 1, %v1163_v10 }
  0x37   :  { %996 = vmatmul.mubr.msk.f32.vlgmr.msra.gmra.mxu0 %vm65_vm0, %v70_v5  ;;  %1003 = vmatmul.mubr.msk.f32.vlgmr.msra.gmra.mxu1 %vm65_vm0, %v70_v5  ;;  %v429_v30 = vrot.slane %v419_v26, %v424_v24  ;;  %vm417_vm7 = vcmp.ne.s32.totalorder %v413_v28, 0  ;;  %vm438_vm8 = vcmp.eq.s32.totalorder %v425_v29, 1  ;;  %v433_v40 = vrot.slane %v420_v31, %v424_v24  ;;  %v511_v31 = vld [vmem:[#allocation3] sm:$0xff] }
  0x38   :  { %1006 = vmatpush3.msra.mxu0 %v72_v1  ;;  %1009 = vmatprep.mubr.msk.f32.mxu0 %vm1162_vm1, %v1161_v0  ;;  %v421_v32 = vsel %vm417_vm7, 1, %v1163_v10 }
  0x39   :  { %1007 = vmatprep.subr.mxu0 %v1161_v0  ;;  %1013 = vmatpush3.msra.mxu1 %v74_v2  ;;  %vm439_vm9 = vcmp.eq.s32.totalorder %v429_v30, 1  ;;  %v437_v41 = vrot.slane %v421_v32, %v424_v24  ;;  %vm440_vm11 = vcmp.eq.s32.totalorder %v433_v40, 1 }
  0x3a   :  { %1008 = vmatpush3.msra.mxu0 %v71_v3  ;;  %1014 = vmatprep.subr.mxu1 %v1161_v0 }
  0x3b   :  { %1015 = vmatpush3.msra.mxu1 %v73_v4  ;;  %1016 = vmatprep.mubr.msk.f32.mxu1 %vm1162_vm1, %v1161_v0  ;;  %vm441_vm12 = vcmp.eq.s32.totalorder %v437_v41, 1 }
  0x3c   :  { %1019 = vmatprep.subr.mxu0 %v1161_v0  ;;  %1026 = vmatprep.subr.mxu1 %v1161_v0 }
  0xef   :  { %v155_v33 = vpop.f32.mrf.mxu0  ;;  %v231_v34 = vpop.f32.mrf.mxu1 }
  0xf0   :  { %v442_v35 = vsel %vm438_vm8, %v155_v33, -10000.0  ;;  %v443_v36 = vsel %vm439_vm9, %v231_v34, -10000.0  ;;  %v512_v34 = vld [vmem:[#allocation3 + $0x8] sm:$0xff] }
  0xf1   :  { %v983_v37 = vpop.f32.mrf.mxu0  ;;  %v451_v38 = vsel %vm450_vm10, %v442_v35, -inf  ;;  %v990_v39 = vpop.f32.mrf.mxu1  ;;  %v454_v42 = vsel %vm450_vm10, %v443_v36, -inf }
  0xf2   :  { %452 = vmax.xlane.f32.xlu0 %v451_v38  ;;  %v513_v38 = vld [vmem:[#allocation3 + $0x10] sm:$0xff] }
  0xf6   :  { %455 = vmax.xlane.f32.xlu0 %v454_v42  ;;  %v514_v42 = vld [vmem:[#allocation3 + $0x18] sm:$0xff] }
  0xf7   :  { %v307_v43 = vpop.f32.mrf.mxu0  ;;  %v383_v44 = vpop.f32.mrf.mxu1 }
  0xf8   :  { %v444_v45 = vsel %vm440_vm11, %v307_v43, -10000.0  ;;  %v445_v46 = vsel %vm441_vm12, %v383_v44, -10000.0 }
  0xf9   :  { %v997_v47 = vpop.f32.mrf.mxu0  ;;  %v457_v48 = vsel %vm450_vm10, %v444_v45, -inf  ;;  %v1004_v49 = vpop.f32.mrf.mxu1  ;;  %v460_v50 = vsel %vm450_vm10, %v445_v46, -inf }
  0xfa   :  { %458 = vmax.xlane.f32.xlu1 %v457_v48 }
  0xfe   :  { %461 = vmax.xlane.f32.xlu1 %v460_v50 }
 0x17b   :  { %v453_v52 = vpop.xlane.xlu0 %452 }
 0x17c   :  { %v463_v53 = vmax.f32 %v446_v51, %v453_v52 }
 0x17e   :  { %v467_v55 = vsub.f32 %v446_v51, %v463_v53  ;;  %868 = vst.msk [vmem:[#allocation2] sm:$0xff] %vm56_vm2, %v463_v53  ;;  %481 = vperm.xlu0 %1044, %v463_v53  }
 0x17f   :  { %v456_v56 = vpop.xlane.xlu0 %455 }
 0x180   :  { %v464_v57 = vmax.f32 %v447_v54, %v456_v56  ;;  %v471_v26 = vmul.f32 1.442695, %v467_v55  ;;  %v540_v55 = vld [vmem:[#allocation4] sm:$0xff] }
 0x182   :  { %v468_v59 = vsub.f32 %v447_v54, %v464_v57  ;;  %869 = vst.msk [vmem:[#allocation2 + $0x8] sm:$0xff] %vm56_vm2, %v464_v57  ;;  %486 = vperm.xlu1 %1045, %v464_v57  }
 0x183   :  { %v459_v60 = vpop.xlane.xlu1 %458 }
 0x184   :  { %v465_v61 = vmax.f32 %v448_v58, %v459_v60 }
 0x186   :  { %v469_v63 = vsub.f32 %v448_v58, %v465_v61  ;;  %870 = vst.msk [vmem:[#allocation2 + $0x10] sm:$0xff] %vm56_vm2, %v465_v61  ;;  %491 = vperm.xlu1 %1045, %v465_v61   ;;  %v541_v58 = vld [vmem:[#allocation4 + $0x8] sm:$0xff] }
 0x187   :  { %v462_v1 = vpop.xlane.xlu1 %461 }
 0x188   :  { %v466_v2 = vmax.f32 %v449_v62, %v462_v1  ;;  %v475_v27 = vmul.f32 1.442695, %v469_v63 }
 0x18a   :  { %v470_v3 = vsub.f32 %v449_v62, %v466_v2  ;;  %871 = vst.msk [vmem:[#allocation2 + $0x18] sm:$0xff] %vm56_vm2, %v466_v2  ;;  %496 = vperm.xlu1 %1045, %v466_v2   ;;  %v542_v2 = vld [vmem:[#allocation4 + $0x10] sm:$0xff] }
 0x1f9   :  { %v482_v4 = vpop.permute.xlu0 %481 }
 0x1fa   :  { %v499_v5 = vsub.f32 %v442_v35, %v482_v4 }
 0x1fc   :  { %v503_v10 = vmul.f32 1.442695, %v499_v5 }
 0x1fd   :  { %v487_v11 = vpop.permute.xlu1 %486 }
 0x1fe   :  { %1046 = vpow2.f32 %v503_v10  ;;  %v500_v12 = vsub.f32 %v443_v36, %v487_v11  ;;  %v543_v11 = vld [vmem:[#allocation4 + $0x18] sm:$0xff] }
 0x200   :  { %v505_v13 = vmul.f32 1.442695, %v500_v12 }
 0x201   :  { %v492_v14 = vpop.permute.xlu1 %491 }
 0x202   :  { %1048 = vpow2.f32 %v505_v13  ;;  %v501_v15 = vsub.f32 %v444_v45, %v492_v14 }
 0x204   :  { %v507_v16 = vmul.f32 1.442695, %v501_v15 }
 0x205   :  { %v497_v17 = vpop.permute.xlu1 %496 }
 0x206   :  { %1050 = vpow2.f32 %v507_v16  ;;  %v502_v18 = vsub.f32 %v445_v46, %v497_v17 }
 0x208   :  { %v509_v19 = vmul.f32 1.442695, %v502_v18 }
 0x20a   :  { %1052 = vpow2.f32 %v509_v19 }
 0x20b   :  { %v1047_v20 = vpop.eup %1046 }
 0x20c   :  { %1010 = vmatmul.mubr.msk.f32.vlgmr.msra.gmra.mxu0 %vm450_vm10, %v1047_v20  ;;  %v519_v21 = vsel %vm450_vm10, %v1047_v20, 0.0 }
 0x20d   :  { %520 = vadd.xlane.f32.xlu1 %v519_v21  ;;  %1020 = vmatpush3.msra.mxu0 %v1220_v6 }
 0x20e   :  { %1021 = vmatprep.subr.mxu0 %v1161_v0  ;;  %1023 = vmatprep.mubr.msk.f32.mxu0 %vm1162_vm1, %v1161_v0 }
 0x20f   :  { %v1049_v22 = vpop.eup %1048  ;;  %1022 = vmatpush3.msra.mxu0 %v1232_v8  ;;  %v473_v8 = vmul.f32 1.442695, %v468_v59 }
 0x210   :  { %1017 = vmatmul.mubr.msk.f32.vlgmr.msra.gmra.mxu1 %vm450_vm10, %v1049_v22  ;;  %v522_v23 = vsel %vm450_vm10, %v1049_v22, 0.0 }
 0x211   :  { %523 = vadd.xlane.f32.xlu0 %v522_v23  ;;  %1027 = vmatpush3.msra.mxu1 %v1223_v7  ;;  %1054 = vpow2.f32 %v473_v8 }
 0x212   :  { %1028 = vmatprep.subr.mxu1 %v1161_v0  ;;  %1030 = vmatprep.mubr.msk.f32.mxu1 %vm1162_vm1, %v1161_v0  ;;  %1056 = vpow2.f32 %v471_v26  ;;  %v477_v0 = vmul.f32 1.442695, %v470_v3 }
 0x213   :  { %v1051_v6 = vpop.eup %1050  ;;  %1029 = vmatpush3.msra.mxu1 %v1235_v9  ;;  %1058 = vpow2.f32 %v475_v27 }
 0x214   :  { %1024 = vmatmul.mubr.msk.f32.vlgmr.msra.gmra.mxu0 %vm450_vm10, %v1051_v6  ;;  %v525_v24 = vsel %vm450_vm10, %v1051_v6, 0.0  ;;  %1060 = vpow2.f32 %v477_v0 }
 0x215   :  { %526 = vadd.xlane.f32.xlu1 %v525_v24 }
 0x217   :  { %v1053_v25 = vpop.eup %1052 }
 0x218   :  { %1031 = vmatmul.mubr.msk.f32.vlgmr.msra.gmra.mxu1 %vm450_vm10, %v1053_v25  ;;  %v528_v7 = vsel %vm450_vm10, %v1053_v25, 0.0 }
 0x219   :  { %529 = vadd.xlane.f32.xlu1 %v528_v7 }
 0x21e   :  { %v1055_v9 = vpop.eup %1054 }
 0x21f   :  { %v1057_v28 = vpop.eup %1056  ;;  %v516_v36 = vmul.f32 %v1055_v9, %v512_v34 }
 0x220   :  { %v1059_v29 = vpop.eup %1058  ;;  %v515_v32 = vmul.f32 %v1057_v28, %v511_v31 }
 0x221   :  { %v1061_v30 = vpop.eup %1060  ;;  %v517_v40 = vmul.f32 %v1059_v29, %v513_v38 }
 0x222   :  { %v518_v45 = vmul.f32 %v1061_v30, %v514_v42 }
 0x227   :  { %551 = vperm.xlu0 %1044, %v1055_v9  }
 0x22a   :  { %546 = vperm.xlu1 %1045, %v1057_v28  }
 0x22e   :  { %556 = vperm.xlu1 %1045, %v1059_v29  }
 0x232   :  { %561 = vperm.xlu1 %1045, %v1061_v30  }
 0x296   :  { %v521_v33 = vpop.xlane.xlu1 %520 }
 0x297   :  { %v531_v35 = vadd.f32 %v521_v33, %v515_v32 }
 0x299   :  { %536 = vst.msk [vmem:[#allocation3] sm:$0xff] %vm56_vm2, %v531_v35 }
 0x29a   :  { %v524_v37 = vpop.xlane.xlu0 %523 }
 0x29b   :  { %v532_v39 = vadd.f32 %v524_v37, %v516_v36 }
 0x29d   :  { %537 = vst.msk [vmem:[#allocation3 + $0x8] sm:$0xff] %vm56_vm2, %v532_v39 }
 0x29e   :  { %v527_v41 = vpop.xlane.xlu1 %526 }
 0x29f   :  { %v533_v43 = vadd.f32 %v527_v41, %v517_v40 }
 0x2a0   :  { %v875_v44 = vld [vmem:[#allocation3] sm:$0xff] }
 0x2a1   :  { %538 = vst.msk [vmem:[#allocation3 + $0x10] sm:$0xff] %vm56_vm2, %v533_v43  ;;  %1062 = vrcp.f32 %v875_v44 }
 0x2a2   :  { %v530_v46 = vpop.xlane.xlu1 %529  ;;  %v552_v59 = vpop.permute.xlu0 %551 }
 0x2a3   :  { %v534_v47 = vadd.f32 %v530_v46, %v518_v45  ;;  %v565_v1 = vmul.f32 %v552_v59, %v541_v58 }
 0x2a4   :  { %v876_v48 = vld [vmem:[#allocation3 + $0x8] sm:$0xff] }
 0x2a5   :  { %539 = vst.msk [vmem:[#allocation3 + $0x18] sm:$0xff] %vm56_vm2, %v534_v47  ;;  %1064 = vrcp.f32 %v876_v48 }
 0x2a6   :  { %v547_v56 = vpop.permute.xlu1 %546 }
 0x2a7   :  { %v564_v57 = vmul.f32 %v547_v56, %v540_v55 }
 0x2a8   :  { %v877_v49 = vld [vmem:[#allocation3 + $0x10] sm:$0xff] }
 0x2a9   :  { %1066 = vrcp.f32 %v877_v49 }
 0x2aa   :  { %v557_v62 = vpop.permute.xlu1 %556 }
 0x2ab   :  { %v566_v10 = vmul.f32 %v557_v62, %v542_v2 }
 0x2ac   :  { %v878_v50 = vld [vmem:[#allocation3 + $0x18] sm:$0xff] }
 0x2ad   :  { %1068 = vrcp.f32 %v878_v50 }
 0x2ae   :  { %v1063_v51 = vpop.eup %1062  ;;  %v562_v12 = vpop.permute.xlu1 %561 }
 0x2af   :  { %893 = vperm.xlu1 %1045, %v1063_v51   ;;  %v567_v16 = vmul.f32 %v562_v12, %v543_v11 }
 0x2b2   :  { %v1065_v52 = vpop.eup %1064 }
 0x2b3   :  { %898 = vperm.xlu0 %1044, %v1065_v52  }
 0x2b6   :  { %v1067_v53 = vpop.eup %1066 }
 0x2b7   :  { %903 = vperm.xlu1 %1045, %v1067_v53  }
 0x2ba   :  { %v1069_v54 = vpop.eup %1068 }
 0x2bb   :  { %908 = vperm.xlu0 %1044, %v1069_v54  }
 0x2cc   :  { %v637_v60 = vpop.f32.mrf.mxu0 }
 0x2cd   :  { %v860_v61 = vadd.f32 %v637_v60, %v564_v57 }
 0x2ce   :  { %v1011_v63 = vpop.f32.mrf.mxu0 }
 0x2cf   :  { %864 = vst.msk [vmem:[#allocation4] sm:$0xff] %vm65_vm0, %v860_v61 }
 0x2d0   :  { %v710_v3 = vpop.f32.mrf.mxu1 }
 0x2d1   :  { %v861_v4 = vadd.f32 %v710_v3, %v565_v1 }
 0x2d2   :  { %v1018_v5 = vpop.f32.mrf.mxu1 }
 0x2d3   :  { %865 = vst.msk [vmem:[#allocation4 + $0x8] sm:$0xff] %vm65_vm0, %v861_v4 }
 0x2d4   :  { %v783_v13 = vpop.f32.mrf.mxu0 }
 0x2d5   :  { %v862_v14 = vadd.f32 %v783_v13, %v566_v10 }
 0x2d6   :  { %v1025_v15 = vpop.f32.mrf.mxu0  ;;  %v887_v20 = vld [vmem:[#allocation4] sm:$0xff] }
 0x2d7   :  { %866 = vst.msk [vmem:[#allocation4 + $0x10] sm:$0xff] %vm65_vm0, %v862_v14 }
 0x2d8   :  { %v856_v17 = vpop.f32.mrf.mxu1 }
 0x2d9   :  { %v863_v18 = vadd.f32 %v856_v17, %v567_v16 }
 0x2da   :  { %v1032_v19 = vpop.f32.mrf.mxu1  ;;  %v888_v23 = vld [vmem:[#allocation4 + $0x8] sm:$0xff] }
 0x2db   :  { %867 = vst.msk [vmem:[#allocation4 + $0x18] sm:$0xff] %vm65_vm0, %v863_v18 }
 0x2de   :  { %v889_v8 = vld [vmem:[#allocation4 + $0x10] sm:$0xff] }
 0x2e2   :  { %v890_v27 = vld [vmem:[#allocation4 + $0x18] sm:$0xff] }
 0x32a   :  { %v894_v21 = vpop.permute.xlu1 %893 }
 0x32b   :  { %v911_v22 = vmul.f32 %v894_v21, %v887_v20 }
 0x32d   :  { %915 = vst.msk [vmem:[#allocation11] sm:$0xff] %vm65_vm0, %v911_v22 }
 0x32e   :  { %v899_v6 = vpop.permute.xlu0 %898 }
 0x32f   :  { %v912_v24 = vmul.f32 %v899_v6, %v888_v23 }
 0x331   :  { %916 = vst.msk [vmem:[#allocation11 + $0x8] sm:$0xff] %vm65_vm0, %v912_v24 }
 0x332   :  { %v904_v25 = vpop.permute.xlu1 %903 }
 0x333   :  { %v913_v26 = vmul.f32 %v904_v25, %v889_v8 }
 0x335   :  { %917 = vst.msk [vmem:[#allocation11 + $0x10] sm:$0xff] %vm65_vm0, %v913_v26 }
 0x336   :  { %v909_v7 = vpop.permute.xlu0 %908 }
 0x337   :  { %v914_v0 = vmul.f32 %v909_v7, %v890_v27 }
 0x339   :  { %918 = vst.msk [vmem:[#allocation11 + $0x18] sm:$0xff] %vm65_vm0, %v914_v0 }
 0x33a   :  { %1141 = shalt.err (!%p1138_p5)
}
 0x33b   :  { %930 = dma.vmem_to_hbm [thread:$0]  %s925_s2, 512, %s1316_s3, [#allocation7], %s1157_s15, %s1157_s15, %s1158_s16  }
 0x33c   :  { %1154 = dma.done.wait [#allocation7], 512  }
 0x33d   :  { %1155 = vsyncadd [#allocation7], 4294966784 }
 0x33e   :  { %934 = vsyncpa [#allocation6], 1 }
 0x33f   :  { %935 = vsyncpa [#allocation9], 1 }
 0x340   :  { %936 = vsyncpa [#allocation7], 1 }

</bundles_post_ra>
